<compile_context>
chip_gen: v7x
topology: tpu7x:2x2x1
jax: 0.10.0
libtpu: 0.0.40
codegen_flags: <defaults>
</compile_context>

<pallas_src>
import jax
import jax.numpy as jnp
from jax.experimental import pallas as pl
from jax.experimental.pallas import tpu as pltpu


def _pos_enc_kernel(x_ref, pos_ref, o_ref):
    # pos tile is either (1, TC) (broadcast over batch rows) or (TB, TC) (sequence-folded
    # layout, already elementwise-aligned); jnp broadcasting covers both. pos is pre-cast.
    o_ref[...] = x_ref[...] + pos_ref[...]


_DEFAULT_TILE_BYTES = 4 << 20   # per x/out tile (Pallas double-buffers each operand)
_TINY_BYPASS_BYTES = 256 << 10  # below this, a plain XLA add beats pallas_call fixed cost
_MAX_FOLD = 4096                # cap on sequence rows folded into one row block


def _round_up(v: int, m: int) -> int:
    return -(-v // m) * m


def _x_tile_budget_bytes() -> int:
    """Per-tile byte budget; larger on v7x where HBM is ~2.3x faster but per-step cost is not."""
    try:
        vmem = int(getattr(pltpu.get_tpu_info(), "vmem_capacity_bytes", 0) or 0)
        if 0 < vmem <= (64 << 20):  # v7x-class: small VMEM, very fast HBM
            return 8 << 20
    except Exception:
        pass
    return _DEFAULT_TILE_BYTES


def _pick_fold(seq: int, rowq: int, d: int):
    """Smallest P (multiple of rowq, divisor of seq) keeping columns (seq//P)*d lane-dense."""
    for p in range(rowq, min(seq, _MAX_FOLD) + 1, rowq):
        if seq % p == 0 and (seq // p) * d >= 128:
            return p
    return None


def positional_encoding(x: jax.Array, pos_table: jax.Array, *, donate_x: bool = False) -> jax.Array:
    """x: (B, S, D) (or (S, D) unbatched); pos_table: (num_positions, D).
    Returns x + pos_table[:S] (cast to x.dtype, broadcast over the batch)."""
    if x.ndim == 2:  # batched=False in the torch module
        return positional_encoding(x[None], pos_table, donate_x=donate_x)[0]
    if x.ndim != 3:
        raise ValueError(f"expected (B, S, D) or (S, D) input, got {x.shape}")

    B, S, D = x.shape
    NP, Dp = pos_table.shape
    if Dp != D:
        raise ValueError(f"pos_table d_model {Dp} != input d_model {D}")
    if S > NP:
        raise ValueError(f"sequence length {S} exceeds num_positions {NP}")

    # One-time slice + cast (negligible; halves pos DMA bytes when x is bf16).
    pos = pos_table[:S].astype(x.dtype)

    SD = S * D
    itemsize = jnp.dtype(x.dtype).itemsize
    # Packed-sublane quantum: 8 rows for 4-byte dtypes, 16 for bf16/f16, 32 for int8/fp8.
    rowq = max(8, 32 // itemsize)

    # Degenerate / tiny inputs: pallas_call fixed cost dominates, let XLA fuse the add.
    if SD < 128 or B * SD * itemsize <= _TINY_BYPASS_BYTES:
        return x + pos[None, :, :]

    # ---- choose a lane-dense 2-D layout (free row-major reshapes) ---------------------------
    fold = None if B >= rowq else _pick_fold(S, rowq, D)
    if fold is None:
        rows, cols = B, SD                 # rows = batch, cols = flattened (S*D)
        x2 = x.reshape(rows, cols)
        pos2 = pos.reshape(1, cols)        # single broadcast row
    else:
        rows, cols = B * fold, (S // fold) * D   # fold `fold` sequence chunks into rows
        x2 = x.reshape(rows, cols)
        pos2 = pos.reshape(fold, cols)     # elementwise-aligned with each batch's row block

    # ---- fixed (rowq, 128)-aligned tiles + cdiv grid (Pallas pads the last block) -----------
    budget = _x_tile_budget_bytes()
    if fold is None:
        tc_cap = max(128, (budget // (rowq * itemsize)) // 128 * 128)
        TC = min(_round_up(cols, 128), tc_cap)
        tb_cap = max(rowq, (budget // (TC * itemsize)) // rowq * rowq)
        TB = min(_round_up(rows, rowq), tb_cap)
    else:
        TB = fold  # one batch element per row block -> pos tile aligns elementwise
        tc_cap = max(128, (budget // (TB * itemsize)) // 128 * 128)
        TC = min(_round_up(cols, 128), tc_cap)

    n_c = pl.cdiv(cols, TC)
    n_b = pl.cdiv(rows, TB)
    PB = pos2.shape[0]

    # Explicit VMEM limit (~2x the double-buffered footprint, capped under v7x's 64 MiB
    # physical) so the enlarged tiles also compile under v5e's 16 MiB scoped default.
    footprint = 2 * (2 * TB * TC + PB * TC) * itemsize
    vmem_limit = int(max(min(max(2 * footprint, 32 << 20), 56 << 20), footprint + (2 << 20)))

    grid_spec = pltpu.PrefetchScalarGridSpec(
        num_scalar_prefetch=0,
        grid=(n_c, n_b),  # columns outermost: pos block index is constant across inner batch steps
        in_specs=[
            pl.BlockSpec((TB, TC), lambda c, b: (b, c)),   # x tile
            pl.BlockSpec((PB, TC), lambda c, b: (0, c)),   # pos tile (reused across batch steps)
        ],
        out_specs=pl.BlockSpec((TB, TC), lambda c, b: (b, c)),
    )

    out2 = pl.pallas_call(
        _pos_enc_kernel,
        out_shape=jax.ShapeDtypeStruct((rows, cols), x.dtype),
        grid_spec=grid_spec,
        compiler_params=pltpu.CompilerParams(
            dimension_semantics=("parallel", "parallel"),
            vmem_limit_bytes=vmem_limit,
        ),
        input_output_aliases={0: 0} if donate_x else {},
    )(x2, pos2)

    return out2.reshape(B, S, D)


def _reference(x, pos_table):
    S = x.shape[-2]
    return x + pos_table[:S].astype(x.dtype)[None, :, :]


if __name__ == "__main__":
    root = jax.random.PRNGKey(0)

    cases = [
        # (name, B, S, D, num_positions, dtype)
        ("module_defaults_tiny", 2, 8, 32, 20, jnp.float32),        # tiny -> XLA fast path
        ("folded_small_batch", 4, 512, 64, 512, jnp.float32),       # Pallas, sequence-folded rows
        ("batched_padded_cols", 16, 100, 50, 128, jnp.float32),     # Pallas, padded last col block
        ("bf16_packed_rows", 4, 1024, 64, 1024, jnp.bfloat16),      # Pallas, rowq=16 fold
    ]

    for i, (name, B, S, D, NP, dtype) in enumerate(cases):
        kx, kw = jax.random.split(jax.random.fold_in(root, i))
        x = jax.random.normal(kx, (B, S, D), dtype=jnp.float32).astype(dtype)
        # nn.Embedding(num_positions, d_model) weight init ~ N(0, 1) (PyTorch default).
        pos_table = jax.random.normal(kw, (NP, D), dtype=jnp.float32)

        out = positional_encoding(x, pos_table)
        jax.block_until_ready(out)

        ref = _reference(x, pos_table)
        assert out.shape == (B, S, D), name
        assert out.dtype == x.dtype, name
        assert jnp.allclose(out.astype(jnp.float32), ref.astype(jnp.float32), atol=1e-6), name

    print("KERNEL_OK")
</pallas_src>

<mosaic_0001>
module attributes {stable_mosaic.version = 11 : i64} {
  func.func @_pos_enc_kernel(%arg0: i32, %arg1: i32, %arg2: memref<8x4096xf32, #tpu.memory_space<vmem>>, %arg3: memref<8x4096xf32, #tpu.memory_space<vmem>>, %arg4: memref<8x4096xf32, #tpu.memory_space<vmem>>) attributes {dimension_semantics = [#tpu.dimension_semantics<parallel>, #tpu.dimension_semantics<parallel>], iteration_bounds = array<i64: 1, 4>, scalar_prefetch = 0 : i64, scratch_operands = 0 : i64, tpu.core_type = #tpu.core_type<tc>, window_params = [{transform_indices = @transform_0, window_bounds = array<i64: 8, 4096>}, {transform_indices = @transform_1, window_bounds = array<i64: 8, 4096>}, {transform_indices = @transform_2, window_bounds = array<i64: 8, 4096>}]} {
    %c0 = arith.constant 0 : index
    %c0_0 = arith.constant 0 : index
    %0 = vector.load %arg2[%c0, %c0_0] : memref<8x4096xf32, #tpu.memory_space<vmem>>, vector<8x4096xf32>
    %c0_1 = arith.constant 0 : index
    %c0_2 = arith.constant 0 : index
    %1 = vector.load %arg3[%c0_1, %c0_2] : memref<8x4096xf32, #tpu.memory_space<vmem>>, vector<8x4096xf32>
    %2 = arith.addf %0, %1 : vector<8x4096xf32>
    %c0_3 = arith.constant 0 : index
    %c0_4 = arith.constant 0 : index
    %3 = vector.load %arg4[%c0_3, %c0_4] : memref<8x4096xf32, #tpu.memory_space<vmem>>, vector<8x4096xf32>
    tpu.vector_store %arg4[%c0_3, %c0_4], %2 {strides = array<i32>} : memref<8x4096xf32, #tpu.memory_space<vmem>>, vector<8x4096xf32>,
    return
  }
  func.func @transform_0(%arg0: i32, %arg1: i32) -> (i32, i32) {
    %c0_i32 = arith.constant 0 : i32
    return %arg1, %arg0 : i32, i32
  }
  func.func @transform_1(%arg0: i32, %arg1: i32) -> (i32, i32) {
    %c0_i32 = arith.constant 0 : i32
    %c0_i32_0 = arith.constant 0 : i32
    return %c0_i32, %arg0 : i32, i32
  }
  func.func @transform_2(%arg0: i32, %arg1: i32) -> (i32, i32) {
    %c0_i32 = arith.constant 0 : i32
    return %arg1, %arg0 : i32, i32
  }
}

</mosaic_0001>

<bundles_post_ra>
// kernel: tpu_custom_call.1
= control target key start
LH: loop header
LB: loop body
LE: loop exit
PB: predicated region body
PF: predicated region fallthrough
CT: control target
= control target key end

     0   :  { %7 = vsyncpa [#allocation3], 0  ;;  %s982_s0 = inlined_call_operand.hbm [shape: f32[32,4096], index: 0, kind: input, shape index: {}]   ;;  %s983_s1 = inlined_call_operand.hbm [shape: f32[8,4096], index: 1, kind: input, shape index: {}]   ;;  %s984_s2 = inlined_call_operand.hbm [shape: f32[32,4096], index: 2, kind: output, shape index: {}]  }
   0x1   :  { %9 = vsyncpa [#allocation3 + $0x1], 0 }
   0x2   :  { %10 = vsyncpa [#allocation6], 0 }
   0x3   :  { %11 = vsyncpa [#allocation4], 0 }
   0x4   :  { %13 = vsyncpa [#allocation4 + $0x1], 0  ;;  %s699_s9 = smov 0   ;;  %s701_s10 = smov 0  }
   0x5   :  { %s703_s11 = smov 0   ;;  %s705_s12 = smov 0  }
   0x6   :  { %s707_s13 = smov 0   ;;  %s709_s14 = smov 0  }
   0x7 LB: > { %s443_s15 = sadd.s32 4294967295, %s679_s14   ;;  %s444_s16 = sadd.s32 4294967294, %s679_s14   ;;  %s679_s14 = sphi %s709_s14, %s19_s14   ;;  %s675_s13 = sphi %s707_s13, %s1008_s13   ;;  %s671_s12 = sphi %s705_s12, %s1007_s12   ;;  %s667_s11 = sphi %s703_s11, %s1006_s11   ;;  %s663_s10 = sphi %s701_s10, %s1005_s10   ;;  %s659_s9 = sphi %s699_s9, %s1004_s9  }
   0x8   : > { %p53_p0 = scmp.ne.s32.totalorder %s663_s10, %s659_s9  ;;  %p733_p1 = scmp.eq.s32.totalorder %s443_s15, 0 }
   0x9   : > { %p737_p2 = scmp.eq.s32.totalorder %s443_s15, 3  ;;  %p111_p3 = scmp.eq.s32.totalorder %s444_s16, 3 }
   0xa   : > { %s989_s17 = scalar_select %p733_p1, 1, 0 }
   0xb   : > { %s990_s18 = scalar_select %p737_p2, 1, 0 }
   0xc   : > { %p743_p4 = por %p733_p1, %p53_p0  ;;  %p445_p5 = scmp.ge.s32.totalorder %s679_s14, 1 }
   0xd   : > { %p748_p6 = por %p111_p3, %p53_p0  ;;  %p118_p7 = scmp.lt.s32.totalorder %s679_s14, 5 }
   0xe   : > { %s991_s19 = scalar_select %p743_p4, 1, 0 }
   0xf   : > { %s992_s20 = scalar_select %p748_p6, 1, 0 }
  0x10   : > { %p753_p8 = pnand %p445_p5, %p118_p7  ;;  %s681_s22 = smov [#allocation5]  }
  0x11   : > { %s134_s23 = sshll.u32 %s681_s22, 4  ;;  %s28_s25 = sadd.s32 1, %s675_s13  ;;  %s135_s23 = int_to_ptr.vmem [resolvable:$true] %s134_s23 }
  0x12   : > { %s993_s21 = scalar_select %p753_p8, 1, 0 }
  0x13   : > { %p470_p9 = pneg %p753_p8  ;;  %s40_s26 = sadd.s32 1, %s667_s11 }
  0x14   : > { %p767_p11 = scmp.ge.s32.totalorder %s28_s25, 4  ;;  %s535_s30 = scalar_lea.hbm %s983_s1, 4096 }
  0x15   : > { %p761_p10 = pnand %p470_p9, %p733_p1  ;;  %p536_p12 = scmp.ne.s32.totalorder %s983_s1, %s535_s30 }
  0x16   : > { %s995_s27 = scalar_select %p767_p11, 1, 0 }
  0x17   : > { %p537_p13 = pneg %p761_p10  ;;  %p542_p5 = scmp.lt.u32.totalorder %s535_s30, %s983_s1 }
  0x19   : > { %p538_p0 = pnand %p537_p13, %p536_p12 }
  0x1b   : > { %p539_p3 = pneg %p538_p0 }
  0x1d   : > { %p544_p7 = pnand %p542_p5, %p539_p3 }
  0x1f   : > { %547 = shalt.err (!%p544_p7)
}
  0x20   : > { %s548_s7 = scalar_lea.vmem %s135_s23, 4096  ;;  %p556_p4 = scmp.lt.s32.totalorder %s135_s23, %s135_s23 }
  0x21   : > { %p549_p9 = scmp.ne.s32.totalorder %s135_s23, %s548_s7  ;;  %p557_p8 = scmp.lt.s32.totalorder %s548_s7, %s548_s7 }
  0x23   : > { %p551_p6 = pnand %p549_p9, %p537_p13  ;;  %p558_p2 = por %p557_p8, %p556_p4 }
  0x25   : > { %p552_p1 = pneg %p551_p6 }
  0x27   : > { %p559_p11 = pnand %p558_p2, %p552_p1 }
  0x29   : > { %562 = shalt.err (!%p559_p11)
}
  0x2a   : > { %473 = dma.hbm_to_vmem [thread:$0]  (!%p761_p10), %s983_s1, 4096, %s135_s23, [#allocation6]  }
  0x2b   : > { %p996_p4 = scmp.ne.s32.totalorder %s995_s27, 0  ;;  %p47_p1 = scmp.ne.s32.totalorder %s667_s11, %s663_s10 }
  0x2c   : > { %p48_p2 = scmp.eq.s32.totalorder %s679_s14, 0  ;;  %p483_p6 = scmp.lt.s32.totalorder %s679_s14, 4 }
  0x2d   : > { %s1010_s25 = smov (%p996_p4, %s28_s25), 0  ;;  %p997_p12 = scmp.ne.s32.totalorder %s990_s18, 0 }
  0x2e   : > { %s35_s16 = ssub.s32 %s675_s13, %s1010_s25  ;;  %p49_p11 = por %p48_p2, %p47_p1 }
  0x2f   : > { %p38_p8 = scmp.eq.s32.totalorder %s35_s16, 0  ;;  %p799_p13 = por %p997_p12, %p47_p1 }
  0x30   : > { %s145_s24 = sand.u32 1, %s667_s11   ;;  %s460_s27 = sshll.u32 %s675_s13, 12 }
  0x31   : > { %s807_s28 = scalar_select %p38_p8, %s667_s11, %s40_s26  }
  0x32   : > { %s448_s23 = sshll.u32 %s145_s24, 8  ;;  %s813_s3 = scalar_lea.hbm %s982_s0, %s460_s27 }
  0x33   : > { %s149_s18 = scalar_lea.vmem [#allocation2], %s448_s23  ;;  %p817_p10 = pnand %p483_p6, %p49_p11 }
  0x34   : > { %s159_s4 = sshll.u32 %s149_s18, 4  ;;  %s146_s26 = scalar_lea.sflag [#allocation3], %s145_s24  ;;  %s815_s4 = int_to_ptr.vmem [resolvable:$true] %s159_s4 }
  0x35   : > { %s563_s6 = scalar_lea.hbm %s813_s3, 4096  ;;  %p565_p3 = pneg %p817_p10 }
  0x36   : > { %p564_p0 = scmp.ne.s32.totalorder %s813_s3, %s563_s6  ;;  %s568_s15 = scalar_lea.hbm %s982_s0, 16384 }
  0x37   : > { %p569_p9 = scmp.lt.u32.totalorder %s813_s3, %s982_s0  ;;  %p570_p4 = scmp.lt.u32.totalorder %s568_s15, %s563_s6 }
  0x38   : > { %p566_p5 = pnand %p565_p3, %p564_p0  ;;  %p572_p2 = scmp.lt.u32.totalorder %s563_s6, %s813_s3 }
  0x39   : > { %p571_p1 = por %p570_p4, %p569_p9 }
  0x3a   : > { %p567_p7 = pneg %p566_p5 }
  0x3b   : > { %p573_p6 = por %p572_p2, %p571_p1 }
  0x3d   : > { %p574_p8 = pnand %p573_p6, %p567_p7 }
  0x3f   : > { %577 = shalt.err (!%p574_p8)
}
  0x40   : > { %s578_s24 = scalar_lea.vmem %s815_s4, 4096  ;;  %s682_s27 = smov [#allocation2]  }
  0x41   : > { %p579_p11 = scmp.ne.s32.totalorder %s815_s4, %s578_s24  ;;  %s583_s29 = sshll.u32 %s682_s27, 4  ;;  %s584_s29 = int_to_ptr.vmem [resolvable:$false] %s583_s29 }
  0x42   : > { %s585_s30 = scalar_lea.vmem %s584_s29, 8192  ;;  %p586_p5 = scmp.lt.s32.totalorder %s815_s4, %s584_s29 }
  0x43   : > { %p581_p12 = pnand %p579_p11, %p565_p3  ;;  %p587_p9 = scmp.lt.s32.totalorder %s585_s30, %s578_s24 }
  0x45   : > { %p582_p0 = pneg %p581_p12  ;;  %p588_p4 = por %p587_p9, %p586_p5 }
  0x47   : > { %p589_p1 = pnand %p588_p4, %p582_p0 }
  0x49   : > { %592 = shalt.err (!%p589_p1)
}
  0x4a   : > { %477 = dma.hbm_to_vmem [thread:$0]  (!%p817_p10), %s813_s3, 4096, %s815_s4, %s146_s26  }
  0x4b   : > { %p1000_p7 = scmp.ne.s32.totalorder %s993_s21, 0 }
  0x4c   : > { %s849_s18 = sand.u32 (!%p1000_p7), 1, %s663_s10   ;;  %p1001_p3 = scmp.ne.s32.totalorder (!%p1000_p7), %s991_s19, 0 }
  0x4d   : > { %168 = sbr.rel (%p1000_p7) target bundleno = 129 (0x81), region = 28  ;;  %s452_s6 = sshll.u32 (!%p1000_p7), %s849_s18, 8 }
  0x4e   : > { %s171_s7 = scalar_lea.sflag (!%p1000_p7), [#allocation3], %s849_s18  ;;  %s853_s8 = scalar_lea.vmem (!%p1000_p7), [#allocation2], %s452_s6 }
  0x54   : > { %646 = dma.done.wait (%p1001_p3), %s171_s7, 4096  }
  0x55   : > { %648 = vsyncadd (%p1001_p3), %s171_s7, 4294963200  ;;  %p1002_p10 = scmp.ne.s32.totalorder %s989_s17, 0 }
  0x57   : > { %650 = dma.done.wait (%p1002_p10), [#allocation6], 4096  }
  0x58   : > { %652 = vsyncadd (%p1002_p10), [#allocation6], 4294963200  ;;  %v202_v0 = vld [vmem:[%s853_s8] sm:$0xff]  ;;  %v203_v2 = vld [vmem:[%s853_s8 + $0x8] sm:$0xff]  ;;  %s868_s17 = scalar_lea.vmem [#allocation7], %s452_s6  ;;  %s461_s19 = sshll.u32 %s671_s12, 12 }
  0x59   : > { %v234_v1 = vld [vmem:[#allocation5] sm:$0xff]  ;;  %v235_v4 = vld [vmem:[#allocation5 + $0x8] sm:$0xff]  ;;  %v204_v5 = vld [vmem:[%s853_s8 + $0x10] sm:$0xff]  ;;  %s347_s21 = sshll.u32 %s868_s17, 4  ;;  %s932_s4 = scalar_lea.hbm %s984_s2, %s461_s19  ;;  %s934_s21 = int_to_ptr.vmem [resolvable:$true] %s347_s21 }
  0x5a   : > { %v266_v3 = vadd.f32 %v234_v1, %v202_v0  ;;  %v236_v6 = vld [vmem:[#allocation5 + $0x10] sm:$0xff]  ;;  %v267_v7 = vadd.f32 %v235_v4, %v203_v2  ;;  %v205_v9 = vld [vmem:[%s853_s8 + $0x18] sm:$0xff]  ;;  %v206_v11 = vld [vmem:[%s853_s8 + $0x20] sm:$0xff]  ;;  %s331_s5 = scalar_lea.sflag [#allocation4], %s849_s18  ;;  %s593_s26 = scalar_lea.vmem %s934_s21, 4096 }
  0x5b   : > { %v268_v8 = vadd.f32 %v236_v6, %v204_v5  ;;  %v237_v10 = vld [vmem:[#allocation5 + $0x18] sm:$0xff]  ;;  %v238_v13 = vld [vmem:[#allocation5 + $0x20] sm:$0xff]  ;;  %v207_v14 = vld [vmem:[%s853_s8 + $0x28] sm:$0xff]  ;;  %p594_p2 = scmp.ne.s32.totalorder %s934_s21, %s593_s26  ;;  %s683_s15 = smov [#allocation7]  }
  0x5c   : > { %298 = vst [vmem:[%s868_s17] sm:$0xff] %v266_v3  ;;  %v269_v12 = vadd.f32 %v237_v10, %v205_v9  ;;  %v239_v15 = vld [vmem:[#allocation5 + $0x28] sm:$0xff]  ;;  %299 = vst [vmem:[%s868_s17 + $0x8] sm:$0xff] %v267_v7  ;;  %v270_v16 = vadd.f32 %v238_v13, %v206_v11  ;;  %v208_v18 = vld [vmem:[%s853_s8 + $0x30] sm:$0xff]  ;;  %s597_s16 = sshll.u32 %s683_s15, 4  ;;  %s598_s16 = int_to_ptr.vmem [resolvable:$false] %s597_s16 }
  0x5d   : > { %300 = vst [vmem:[%s868_s17 + $0x10] sm:$0xff] %v268_v8  ;;  %v271_v17 = vadd.f32 %v239_v15, %v207_v14  ;;  %v240_v19 = vld [vmem:[#allocation5 + $0x30] sm:$0xff]  ;;  %v209_v20 = vld [vmem:[%s853_s8 + $0x38] sm:$0xff]  ;;  %v210_v23 = vld [vmem:[%s853_s8 + $0x40] sm:$0xff]  ;;  %p595_p6 = pnand %p594_p2, %p799_p13  ;;  %s599_s23 = scalar_lea.vmem %s598_s16, 8192 }
  0x5e   : > { %301 = vst [vmem:[%s868_s17 + $0x18] sm:$0xff] %v269_v12  ;;  %v272_v21 = vadd.f32 %v240_v19, %v208_v18  ;;  %v241_v22 = vld [vmem:[#allocation5 + $0x38] sm:$0xff]  ;;  %v242_v24 = vld [vmem:[#allocation5 + $0x40] sm:$0xff]  ;;  %302 = vst [vmem:[%s868_s17 + $0x20] sm:$0xff] %v270_v16  ;;  %p600_p11 = scmp.lt.s32.totalorder %s934_s21, %s598_s16  ;;  %p601_p12 = scmp.lt.s32.totalorder %s599_s23, %s593_s26 }
  0x5f   : > { %303 = vst [vmem:[%s868_s17 + $0x28] sm:$0xff] %v271_v17  ;;  %v273_v25 = vadd.f32 %v241_v22, %v209_v20  ;;  %v274_v26 = vadd.f32 %v242_v24, %v210_v23  ;;  %v211_v27 = vld [vmem:[%s853_s8 + $0x48] sm:$0xff]  ;;  %v212_v29 = vld [vmem:[%s853_s8 + $0x50] sm:$0xff]  ;;  %v213_v32 = vld [vmem:[%s853_s8 + $0x58] sm:$0xff]  ;;  %p596_p8 = pneg %p595_p6 }
  0x60   : > { %v243_v28 = vld [vmem:[#allocation5 + $0x48] sm:$0xff]  ;;  %304 = vst [vmem:[%s868_s17 + $0x30] sm:$0xff] %v272_v21  ;;  %v244_v31 = vld [vmem:[#allocation5 + $0x50] sm:$0xff]  ;;  %v245_v33 = vld [vmem:[#allocation5 + $0x58] sm:$0xff]  ;;  %p602_p0 = por %p601_p12, %p600_p11 }
  0x61   : > { %v275_v30 = vadd.f32 %v243_v28, %v211_v27  ;;  %305 = vst [vmem:[%s868_s17 + $0x38] sm:$0xff] %v273_v25  ;;  %306 = vst [vmem:[%s868_s17 + $0x40] sm:$0xff] %v274_v26  ;;  %v276_v34 = vadd.f32 %v244_v31, %v212_v29  ;;  %v277_v35 = vadd.f32 %v245_v33, %v213_v32  ;;  %v214_v36 = vld [vmem:[%s853_s8 + $0x60] sm:$0xff]  ;;  %v215_v38 = vld [vmem:[%s853_s8 + $0x68] sm:$0xff] }
  0x62   : > { %v246_v37 = vld [vmem:[#allocation5 + $0x60] sm:$0xff]  ;;  %v247_v40 = vld [vmem:[#allocation5 + $0x68] sm:$0xff]  ;;  %v216_v41 = vld [vmem:[%s853_s8 + $0x70] sm:$0xff]  ;;  %p603_p5 = pnand %p602_p0, %p596_p8 }
  0x63   : > { %307 = vst [vmem:[%s868_s17 + $0x48] sm:$0xff] %v275_v30  ;;  %v278_v39 = vadd.f32 %v246_v37, %v214_v36  ;;  %v248_v42 = vld [vmem:[#allocation5 + $0x70] sm:$0xff]  ;;  %308 = vst [vmem:[%s868_s17 + $0x50] sm:$0xff] %v276_v34  ;;  %v279_v43 = vadd.f32 %v247_v40, %v215_v38  ;;  %v217_v45 = vld [vmem:[%s853_s8 + $0x78] sm:$0xff] }
  0x64   : > { %309 = vst [vmem:[%s868_s17 + $0x58] sm:$0xff] %v277_v35  ;;  %v280_v44 = vadd.f32 %v248_v42, %v216_v41  ;;  %v249_v46 = vld [vmem:[#allocation5 + $0x78] sm:$0xff]  ;;  %v218_v47 = vld [vmem:[%s853_s8 + $0x80] sm:$0xff]  ;;  %v219_v50 = vld [vmem:[%s853_s8 + $0x88] sm:$0xff] }
  0x65   : > { %310 = vst [vmem:[%s868_s17 + $0x60] sm:$0xff] %v278_v39  ;;  %v281_v48 = vadd.f32 %v249_v46, %v217_v45  ;;  %v250_v49 = vld [vmem:[#allocation5 + $0x80] sm:$0xff]  ;;  %v251_v51 = vld [vmem:[#allocation5 + $0x88] sm:$0xff]  ;;  %311 = vst [vmem:[%s868_s17 + $0x68] sm:$0xff] %v279_v43 }
  0x66   : > { %312 = vst [vmem:[%s868_s17 + $0x70] sm:$0xff] %v280_v44  ;;  %v282_v52 = vadd.f32 %v250_v49, %v218_v47  ;;  %v283_v53 = vadd.f32 %v251_v51, %v219_v50  ;;  %v220_v54 = vld [vmem:[%s853_s8 + $0x90] sm:$0xff]  ;;  %v221_v56 = vld [vmem:[%s853_s8 + $0x98] sm:$0xff]  ;;  %v222_v59 = vld [vmem:[%s853_s8 + $0xa0] sm:$0xff] }
  0x67   : > { %v252_v55 = vld [vmem:[#allocation5 + $0x90] sm:$0xff]  ;;  %313 = vst [vmem:[%s868_s17 + $0x78] sm:$0xff] %v281_v48  ;;  %v253_v58 = vld [vmem:[#allocation5 + $0x98] sm:$0xff]  ;;  %v254_v60 = vld [vmem:[#allocation5 + $0xa0] sm:$0xff] }
  0x68   : > { %v284_v57 = vadd.f32 %v252_v55, %v220_v54  ;;  %314 = vst [vmem:[%s868_s17 + $0x80] sm:$0xff] %v282_v52  ;;  %315 = vst [vmem:[%s868_s17 + $0x88] sm:$0xff] %v283_v53  ;;  %v285_v61 = vadd.f32 %v253_v58, %v221_v56  ;;  %v286_v62 = vadd.f32 %v254_v60, %v222_v59  ;;  %v223_v63 = vld [vmem:[%s853_s8 + $0xa8] sm:$0xff]  ;;  %v224_v1 = vld [vmem:[%s853_s8 + $0xb0] sm:$0xff] }
  0x69   : > { %v255_v0 = vld [vmem:[#allocation5 + $0xa8] sm:$0xff]  ;;  %v256_v3 = vld [vmem:[#allocation5 + $0xb0] sm:$0xff]  ;;  %v225_v4 = vld [vmem:[%s853_s8 + $0xb8] sm:$0xff] }
  0x6a   : > { %316 = vst [vmem:[%s868_s17 + $0x90] sm:$0xff] %v284_v57  ;;  %v287_v2 = vadd.f32 %v255_v0, %v223_v63  ;;  %v257_v5 = vld [vmem:[#allocation5 + $0xb8] sm:$0xff]  ;;  %317 = vst [vmem:[%s868_s17 + $0x98] sm:$0xff] %v285_v61  ;;  %v288_v6 = vadd.f32 %v256_v3, %v224_v1  ;;  %v226_v8 = vld [vmem:[%s853_s8 + $0xc0] sm:$0xff] }
  0x6b   : > { %318 = vst [vmem:[%s868_s17 + $0xa0] sm:$0xff] %v286_v62  ;;  %v289_v7 = vadd.f32 %v257_v5, %v225_v4  ;;  %v258_v9 = vld [vmem:[#allocation5 + $0xc0] sm:$0xff]  ;;  %v227_v10 = vld [vmem:[%s853_s8 + $0xc8] sm:$0xff]  ;;  %v228_v13 = vld [vmem:[%s853_s8 + $0xd0] sm:$0xff] }
  0x6c   : > { %319 = vst [vmem:[%s868_s17 + $0xa8] sm:$0xff] %v287_v2  ;;  %v290_v11 = vadd.f32 %v258_v9, %v226_v8  ;;  %v259_v12 = vld [vmem:[#allocation5 + $0xc8] sm:$0xff]  ;;  %v260_v14 = vld [vmem:[#allocation5 + $0xd0] sm:$0xff]  ;;  %320 = vst [vmem:[%s868_s17 + $0xb0] sm:$0xff] %v288_v6 }
  0x6d   : > { %321 = vst [vmem:[%s868_s17 + $0xb8] sm:$0xff] %v289_v7  ;;  %v291_v15 = vadd.f32 %v259_v12, %v227_v10  ;;  %v292_v16 = vadd.f32 %v260_v14, %v228_v13  ;;  %v229_v17 = vld [vmem:[%s853_s8 + $0xd8] sm:$0xff]  ;;  %v230_v19 = vld [vmem:[%s853_s8 + $0xe0] sm:$0xff]  ;;  %v231_v22 = vld [vmem:[%s853_s8 + $0xe8] sm:$0xff] }
  0x6e   : > { %v261_v18 = vld [vmem:[#allocation5 + $0xd8] sm:$0xff]  ;;  %322 = vst [vmem:[%s868_s17 + $0xc0] sm:$0xff] %v290_v11  ;;  %v262_v21 = vld [vmem:[#allocation5 + $0xe0] sm:$0xff]  ;;  %v263_v23 = vld [vmem:[#allocation5 + $0xe8] sm:$0xff] }
  0x6f   : > { %v293_v20 = vadd.f32 %v261_v18, %v229_v17  ;;  %323 = vst [vmem:[%s868_s17 + $0xc8] sm:$0xff] %v291_v15  ;;  %324 = vst [vmem:[%s868_s17 + $0xd0] sm:$0xff] %v292_v16  ;;  %v294_v24 = vadd.f32 %v262_v21, %v230_v19  ;;  %v295_v25 = vadd.f32 %v263_v23, %v231_v22  ;;  %v232_v26 = vld [vmem:[%s853_s8 + $0xf0] sm:$0xff]  ;;  %v233_v28 = vld [vmem:[%s853_s8 + $0xf8] sm:$0xff] }
  0x70   : > { %v264_v27 = vld [vmem:[#allocation5 + $0xf0] sm:$0xff]  ;;  %v265_v30 = vld [vmem:[#allocation5 + $0xf8] sm:$0xff] }
  0x71   : > { %325 = vst [vmem:[%s868_s17 + $0xd8] sm:$0xff] %v293_v20  ;;  %v296_v29 = vadd.f32 %v264_v27, %v232_v26  ;;  %326 = vst [vmem:[%s868_s17 + $0xe0] sm:$0xff] %v294_v24  ;;  %v297_v31 = vadd.f32 %v265_v30, %v233_v28 }
  0x72   : > { %327 = vst [vmem:[%s868_s17 + $0xe8] sm:$0xff] %v295_v25 }
  0x73   : > { %328 = vst [vmem:[%s868_s17 + $0xf0] sm:$0xff] %v296_v29  ;;  %329 = vst [vmem:[%s868_s17 + $0xf8] sm:$0xff] %v297_v31 }
  0x74   : > { %606 = shalt.err (!%p603_p5)
}
  0x75   : > { %s607_s24 = scalar_lea.hbm %s932_s4, 4096  ;;  %s611_s30 = scalar_lea.hbm %s984_s2, 16384 }
  0x76   : > { %p608_p9 = scmp.ne.s32.totalorder %s932_s4, %s607_s24  ;;  %p612_p7 = scmp.lt.u32.totalorder %s932_s4, %s984_s2 }
  0x77   : > { %p613_p3 = scmp.lt.u32.totalorder %s611_s30, %s607_s24  ;;  %p615_p2 = scmp.lt.u32.totalorder %s607_s24, %s932_s4 }
  0x78   : > { %p609_p4 = pnand %p608_p9, %p799_p13 }
  0x79   : > { %p614_p10 = por %p613_p3, %p612_p7 }
  0x7a   : > { %p610_p1 = pneg %p609_p4 }
  0x7b   : > { %p616_p6 = por %p615_p2, %p614_p10 }
  0x7d   : > { %p617_p8 = pnand %p616_p6, %p610_p1 }
  0x7f   : > { %620 = shalt.err (!%p617_p8)
}
  0x80   : > { %468 = dma.vmem_to_hbm [thread:$0]  (%p799_p13), %s934_s21, 4096, %s932_s4, %s331_s5  }
  0x81 PF: > { %p485_p11 = scmp.ge.s32.totalorder %s679_s14, 2  ;;  %s359_s7 = sand.u32 1, %s659_s9  }
  0x82   : > { %p1003_p12 = scmp.ne.s32.totalorder %s992_s20, 0  ;;  %s360_s8 = scalar_lea.sflag [#allocation4], %s359_s7 }
  0x84   : > { %p479_p0 = pnand %p485_p11, %p1003_p12 }
  0x86   : > { %654 = dma.done.wait (!%p479_p0), %s360_s8, 4096  }
  0x87   : > { %656 = vsyncadd (!%p479_p0), %s360_s8, 4294963200  ;;  %s19_s14 = sadd.s32 1, %s679_s14   ;;  %s1004_s9 = smov %s663_s10 }
  0x88   : > { %p16_p5 = scmp.ge.s32.totalorder %s19_s14, 6   ;;  %s1005_s10 = smov %s667_s11 }
  0x89   : > { %s1006_s11 = smov %s807_s28  ;;  %s1007_s12 = smov %s675_s13 }
  0x8a   : > { %s1008_s13 = smov %s1010_s25  ;;  %18 = sbr.rel (!%p16_p5) target bundleno = 7 (0x7), region = 78 }
  0x91   :  { %365 = vsyncpa [#allocation3], 1 }
  0x92   :  { %367 = vsyncpa [#allocation3 + $0x1], 1 }
  0x93   :  { %368 = vsyncpa [#allocation6], 1 }
  0x94   :  { %369 = vsyncpa [#allocation4], 1 }
  0x95   :  { %371 = vsyncpa [#allocation4 + $0x1], 1 }

</bundles_post_ra>
